<compile_context>
chip_gen: v7x
topology: tpu7x:2x2x1
jax: 0.10.0
libtpu: 0.0.40
codegen_flags: <defaults>
</compile_context>

<pallas_src>
import functools

import jax
import jax.numpy as jnp
from jax.experimental import pallas as pl
from jax.experimental.pallas import tpu as pltpu


def se_kernel(x_ref, w1t_ref, w2t_ref, o_ref, *, mode):
    """One grid step processes a block of (batch*channel) rows.

    x_ref   : (Rb, K, W)  input rows (Rb rows of the folded B*N axis)
    w1t_ref : (K, Kr)     fc layer-1 weight, pre-transposed (W1.T)
    w2t_ref : (Kr, K)     fc layer-2 weight, pre-transposed (W2.T)
    o_ref   : (Rb, K, W)  output rows
    """
    x = x_ref[...].astype(jnp.float32)                       # (Rb, K, W)

    # AdaptiveAvgPool2d((K, 1)) / AdaptiveMaxPool2d((K, 1)) on an input whose
    # "H" dim is already K reduces only over the trailing W dim.
    if mode == "avg":
        v = jnp.mean(x, axis=-1)                              # (Rb, K)
    else:
        v = jnp.max(x, axis=-1)                               # (Rb, K)

    # Fused FC chain on the MXU: Linear(K->Kr, no bias) -> ReLU -> Linear(Kr->K).
    h = jnp.maximum(
        jnp.dot(v, w1t_ref[...], preferred_element_type=jnp.float32), 0.0)
    s = jax.nn.sigmoid(
        jnp.dot(h, w2t_ref[...], preferred_element_type=jnp.float32))  # (Rb, K)

    o_ref[...] = (x * s[:, :, None]).astype(o_ref.dtype)


def _pick_row_block(R, K, W, itemsize):
    """Pick the per-grid-step row block.

    Amortizes per-step pipeline overhead by taking as many rows as a small VMEM
    budget allows, but keeps >= 2 grid blocks (when R >= 2) so the parallel grid
    axis can be sharded across v7x's two TensorCores.  Budget of 8 MiB of tiles
    (in + out, double-buffered) stays well inside every generation's scoped VMEM
    (16 MiB default on v5e, 32 MiB on v6e/v7x), so no vmem_limit override needed.
    """
    budget_bytes = 8 * 1024 * 1024
    per_row = K * W * itemsize
    max_rows = max(1, budget_bytes // (4 * per_row))          # 2 bufs x (in + out)
    target = min(max_rows, max(1, R // 2)) if R >= 2 else 1
    best = 1
    for d in range(1, R + 1):
        if R % d == 0 and d <= target:
            best = d
    return best


def se_block(x, w1, w2, *, mode="avg"):
    """x: (B, N, K, W); w1: (Kr, K) [Linear(K, Kr)]; w2: (K, Kr) [Linear(Kr, K)]."""
    assert mode in ("avg", "max")
    B, N, K, W = x.shape
    Kr = w1.shape[0]
    assert w1.shape == (Kr, K), w1.shape
    assert w2.shape == (K, Kr), w2.shape

    # Fold batch and channel dims into one row axis so the FC matmul LHS is
    # (rows, K) instead of many tiny per-batch matmuls.
    R = B * N
    x2 = x.reshape(R, K, W)
    r_blk = _pick_row_block(R, K, W, x.dtype.itemsize)
    grid = (R // r_blk,)

    kernel = functools.partial(se_kernel, mode=mode)

    out = pl.pallas_call(
        kernel,
        out_shape=jax.ShapeDtypeStruct((R, K, W), x.dtype),
        grid_spec=pltpu.PrefetchScalarGridSpec(
            num_scalar_prefetch=0,
            grid=grid,
            in_specs=[
                pl.BlockSpec((r_blk, K, W), lambda r: (r, 0, 0)),
                pl.BlockSpec((K, Kr), lambda r: (0, 0)),
                pl.BlockSpec((Kr, K), lambda r: (0, 0)),
            ],
            out_specs=pl.BlockSpec((r_blk, K, W), lambda r: (r, 0, 0)),
        ),
        compiler_params=pltpu.CompilerParams(
            dimension_semantics=("parallel",)),
    )(x2, w1.T, w2.T)

    return out.reshape(B, N, K, W)


def se_reference(x, w1, w2, mode):
    """Pure-JAX reference mirroring the PyTorch SEBlock forward exactly."""
    if mode == "avg":
        v = x.mean(-1)                                        # (B, N, K)
    else:
        v = x.max(-1)
    v = jnp.maximum(v @ w1.T, 0.0) @ w2.T                     # fc chain, no bias
    v = jax.nn.sigmoid(v)[..., None]                          # (B, N, K, 1)
    return x * v


if __name__ == "__main__":
    # Small shapes consistent with the module: x = (B, N, K_IMP, W)
    B, N, K_IMP, W = 2, 4, 8, 16
    ratio = 1
    Kr = K_IMP // ratio

    key = jax.random.PRNGKey(0)
    kx, k1, k2 = jax.random.split(key, 3)

    x = jax.random.normal(kx, (B, N, K_IMP, W), dtype=jnp.float32)
    # nn.Linear(K_IMP, K_IMP//ratio, bias=False) weight: (Kr, K_IMP)
    w1 = jax.random.normal(k1, (Kr, K_IMP), dtype=jnp.float32) * 0.3
    # nn.Linear(K_IMP//ratio, K_IMP, bias=False) weight: (K_IMP, Kr)
    w2 = jax.random.normal(k2, (K_IMP, Kr), dtype=jnp.float32) * 0.3

    for mode in ("avg", "max"):
        out = jax.block_until_ready(se_block(x, w1, w2, mode=mode))
        ref = jax.block_until_ready(se_reference(x, w1, w2, mode))
        assert out.shape == x.shape and out.dtype == x.dtype
        err = jnp.max(jnp.abs(out - ref))
        assert jnp.allclose(out, ref, atol=1e-5, rtol=1e-5), (
            f"mode={mode} max abs err {err}")

    print("KERNEL_OK")
</pallas_src>

<mosaic_0001>
module attributes {stable_mosaic.version = 11 : i64} {
  func.func @se_kernel(%arg0: i32, %arg1: memref<4x8x16xf32, #tpu.memory_space<vmem>>, %arg2: memref<8x8xf32, #tpu.memory_space<vmem>>, %arg3: memref<8x8xf32, #tpu.memory_space<vmem>>, %arg4: memref<4x8x16xf32, #tpu.memory_space<vmem>>) attributes {dimension_semantics = [#tpu.dimension_semantics<parallel>], iteration_bounds = array<i64: 2>, scalar_prefetch = 0 : i64, scratch_operands = 0 : i64, tpu.core_type = #tpu.core_type<tc>, window_params = [{transform_indices = @transform_0, window_bounds = array<i64: 4, 8, 16>}, {pipeline_mode = #tpu.pipeline_mode<synchronous>, transform_indices = @transform_1, window_bounds = array<i64: 8, 8>}, {pipeline_mode = #tpu.pipeline_mode<synchronous>, transform_indices = @transform_2, window_bounds = array<i64: 8, 8>}, {transform_indices = @transform_3, window_bounds = array<i64: 4, 8, 16>}]} {
    %c0 = arith.constant 0 : index
    %c0_0 = arith.constant 0 : index
    %c0_1 = arith.constant 0 : index
    %0 = vector.load %arg1[%c0, %c0_0, %c0_1] : memref<4x8x16xf32, #tpu.memory_space<vmem>>, vector<4x8x16xf32>
    %cst = arith.constant dense<0.000000e+00> : vector<4x8xf32>
    %1 = vector.multi_reduction <add>, %0, %cst [2] : vector<4x8x16xf32> to vector<4x8xf32>
    %cst_2 = arith.constant 1.600000e+01 : f32
    %2 = vector.broadcast %cst_2 : f32 to vector<4x8xf32>
    %3 = arith.divf %1, %2 : vector<4x8xf32>
    %c0_3 = arith.constant 0 : index
    %c0_4 = arith.constant 0 : index
    %4 = vector.load %arg2[%c0_3, %c0_4] : memref<8x8xf32, #tpu.memory_space<vmem>>, vector<8x8xf32>
    %cst_5 = arith.constant dense<0.000000e+00> : vector<4x8xf32>
    %5 = tpu.matmul %3, %4, %cst_5 {dimension_numbers = #tpu.dot_dimension_numbers<[1], [0], [0], [1], [0, 0, 1, 1], [], []>} : vector<4x8xf32>, vector<8x8xf32>, vector<4x8xf32> -> vector<4x8xf32>
    %cst_6 = arith.constant 0.000000e+00 : f32
    %6 = vector.broadcast %cst_6 : f32 to vector<4x8xf32>
    %7 = arith.maximumf %5, %6 : vector<4x8xf32>
    %c0_7 = arith.constant 0 : index
    %c0_8 = arith.constant 0 : index
    %8 = vector.load %arg3[%c0_7, %c0_8] : memref<8x8xf32, #tpu.memory_space<vmem>>, vector<8x8xf32>
    %cst_9 = arith.constant dense<0.000000e+00> : vector<4x8xf32>
    %9 = tpu.matmul %7, %8, %cst_9 {dimension_numbers = #tpu.dot_dimension_numbers<[1], [0], [0], [1], [0, 0, 1, 1], [], []>} : vector<4x8xf32>, vector<8x8xf32>, vector<4x8xf32> -> vector<4x8xf32>
    %10 = arith.negf %9 : vector<4x8xf32>
    %11 = math.exp %10 : vector<4x8xf32>
    %cst_10 = arith.constant 1.000000e+00 : f32
    %12 = vector.broadcast %cst_10 : f32 to vector<4x8xf32>
    %13 = arith.addf %12, %11 : vector<4x8xf32>
    %14 = arith.divf %12, %13 : vector<4x8xf32>
    %15 = vector.shape_cast %14 : vector<4x8xf32> to vector<4x8x1xf32>
    %16 = vector.broadcast %15 : vector<4x8x1xf32> to vector<4x8x16xf32>
    %17 = arith.mulf %0, %16 : vector<4x8x16xf32>
    %c0_11 = arith.constant 0 : index
    %c0_12 = arith.constant 0 : index
    %c0_13 = arith.constant 0 : index
    %18 = vector.load %arg4[%c0_11, %c0_12, %c0_13] : memref<4x8x16xf32, #tpu.memory_space<vmem>>, vector<4x8x16xf32>
    tpu.vector_store %arg4[%c0_11, %c0_12, %c0_13], %17 {strides = array<i32>} : memref<4x8x16xf32, #tpu.memory_space<vmem>>, vector<4x8x16xf32>,
    return
  }
  func.func @transform_0(%arg0: i32) -> (i32, i32, i32) {
    %c0_i32 = arith.constant 0 : i32
    %c0_i32_0 = arith.constant 0 : i32
    %c0_i32_1 = arith.constant 0 : i32
    return %arg0, %c0_i32, %c0_i32_0 : i32, i32, i32
  }
  func.func @transform_1(%arg0: i32) -> (i32, i32) {
    %c0_i32 = arith.constant 0 : i32
    %c0_i32_0 = arith.constant 0 : i32
    %c0_i32_1 = arith.constant 0 : i32
    return %c0_i32, %c0_i32_0 : i32, i32
  }
  func.func @transform_2(%arg0: i32) -> (i32, i32) {
    %c0_i32 = arith.constant 0 : i32
    %c0_i32_0 = arith.constant 0 : i32
    %c0_i32_1 = arith.constant 0 : i32
    return %c0_i32, %c0_i32_0 : i32, i32
  }
  func.func @transform_3(%arg0: i32) -> (i32, i32, i32) {
    %c0_i32 = arith.constant 0 : i32
    %c0_i32_0 = arith.constant 0 : i32
    %c0_i32_1 = arith.constant 0 : i32
    return %arg0, %c0_i32, %c0_i32_0 : i32, i32, i32
  }
}

</mosaic_0001>

<bundles_post_ra>
// kernel: tpu_custom_call.1
= control target key start
LH: loop header
LB: loop body
LE: loop exit
PB: predicated region body
PF: predicated region fallthrough
CT: control target
= control target key end

     0   :  { %8 = vsyncpa [#allocation3], 0  ;;  %s1124_s0 = inlined_call_operand.hbm [shape: f32[8,8,16], index: 0, kind: input, shape index: {}]   ;;  %s1125_s1 = inlined_call_operand.hbm [shape: f32[8,8], index: 1, kind: input, shape index: {}]   ;;  %s1126_s2 = inlined_call_operand.hbm [shape: f32[8,8], index: 2, kind: input, shape index: {}]   ;;  %s1127_s3 = inlined_call_operand.hbm [shape: f32[8,8,16], index: 3, kind: output, shape index: {}]  }
   0x1   :  { %10 = vsyncpa [#allocation3 + $0x1], 0 }
   0x2   :  { %11 = vsyncpa [#allocation6], 0 }
   0x3   :  { %12 = vsyncpa [#allocation4], 0 }
   0x4   :  { %14 = vsyncpa [#allocation4 + $0x1], 0  ;;  %s865_s12 = smov 0   ;;  %s867_s13 = smov 0  }
   0x5   :  { %s869_s14 = smov 0   ;;  %s871_s15 = smov 0  }
   0x6 LB: > { %s886_s16 = sadd.s32 4294967295, %s833_s15   ;;  %s563_s17 = sadd.s32 4294967294, %s833_s15   ;;  %s833_s15 = sphi %s871_s15, %s1152_s15   ;;  %s829_s14 = sphi %s869_s14, %s1151_s14   ;;  %s825_s13 = sphi %s867_s13, %s1150_s13   ;;  %s821_s12 = sphi %s865_s12, %s1149_s12  }
   0x7   : > { %s890_s18 = sadd.s32 1, %s833_s15   ;;  %s27_s19 = sadd.s32 1, %s829_s14 }
   0x8   : > { %s24_s20 = ssub.s32 %s833_s15, %s890_s18  ;;  %p34_p0 = scmp.ne.s32.totalorder %s829_s14, %s825_s13 }
   0x9   : > { %p25_p1 = scmp.eq.s32.totalorder %s24_s20, 0  ;;  %p35_p2 = scmp.eq.s32.totalorder %s833_s15, 0 }
   0xa   : > { %p40_p3 = scmp.ne.s32.totalorder %s825_s13, %s821_s12  ;;  %p1128_p4 = scmp.eq.s32.totalorder %s886_s16, 0 }
   0xb   : > { %s902_s21 = scalar_select %p25_p1, %s829_s14, %s27_s19  }
   0xc   : > { %p904_p5 = por %p35_p2, %p34_p0  ;;  %p910_p6 = por %p1128_p4, %p40_p3 }
   0xd   : > { %p106_p7 = scmp.eq.s32.totalorder %s886_s16, 1  ;;  %p112_p8 = scmp.eq.s32.totalorder %s563_s17, 1 }
   0xe   : > { %s1134_s23 = scalar_select %p910_p6, 1, 0 }
   0xf   : > { %p564_p9 = scmp.ge.s32.totalorder %s833_s15, 1  ;;  %p119_p10 = scmp.lt.s32.totalorder %s833_s15, 3 }
  0x10   : > { %p917_p11 = por %p106_p7, %p34_p0  ;;  %p921_p12 = por %p112_p8, %p40_p3 }
  0x11   : > { %p925_p13 = pnand %p564_p9, %p119_p10  ;;  %s835_s27 = smov [#allocation5]  }
  0x12   : > { %s1135_s24 = scalar_select %p917_p11, 1, 0 }
  0x13   : > { %s1136_s25 = scalar_select %p921_p12, 1, 0 }
  0x14   : > { %s1137_s26 = scalar_select %p925_p13, 1, 0 }
  0x15   : > { %p612_p2 = pneg %p925_p13  ;;  %s132_s28 = sshll.u32 %s835_s27, 4  ;;  %s133_s28 = int_to_ptr.vmem [resolvable:$true] %s132_s28 }
  0x16   : > { %p629_p4 = scmp.lt.s32.totalorder %s833_s15, 2  ;;  %p1138_p0 = scmp.eq.s32.totalorder %s886_s16, 0 }
  0x17   : > { %s836_s4 = smov [#allocation7]   ;;  %s677_s8 = scalar_lea.hbm %s1125_s1, 128 }
  0x18   : > { %p935_p7 = pnand %p612_p2, %p1138_p0  ;;  %p941_p3 = pnand %p629_p4, %p904_p5 }
  0x19   : > { %s143_s5 = sshll.u32 %s836_s4, 4  ;;  %p678_p8 = scmp.ne.s32.totalorder %s1125_s1, %s677_s8  ;;  %s945_s5 = int_to_ptr.vmem [resolvable:$true] %s143_s5 }
  0x1a   : > { %s1140_s30 = scalar_select %p941_p3, 1, 0 }
  0x1b   : > { %p679_p9 = pneg %p935_p7  ;;  %p684_p10 = scmp.lt.u32.totalorder %s677_s8, %s1125_s1 }
  0x1d   : > { %p680_p4 = pnand %p679_p9, %p678_p8 }
  0x1f   : > { %p681_p5 = pneg %p680_p4 }
  0x21   : > { %p686_p2 = pnand %p684_p10, %p681_p5 }
  0x23   : > { %689 = shalt.err (!%p686_p2)
}
  0x24   : > { %s690_s19 = scalar_lea.vmem %s133_s28, 128  ;;  %p698_p11 = scmp.lt.s32.totalorder %s133_s28, %s133_s28 }
  0x25   : > { %p691_p0 = scmp.ne.s32.totalorder %s133_s28, %s690_s19  ;;  %p699_p6 = scmp.lt.s32.totalorder %s690_s19, %s690_s19 }
  0x27   : > { %p693_p1 = pnand %p691_p0, %p679_p9  ;;  %p700_p13 = por %p699_p6, %p698_p11 }
  0x29   : > { %p694_p12 = pneg %p693_p1 }
  0x2b   : > { %p701_p3 = pnand %p700_p13, %p694_p12 }
  0x2d   : > { %704 = shalt.err (!%p701_p3)
}
  0x2e   : > { %615 = dma.hbm_to_vmem [thread:$0]  (!%p935_p7), %s1125_s1, 128, %s133_s28, [#allocation6]  }
  0x2f   : > { %s154_s27 = sand.u32 1, %s829_s14   ;;  %s705_s7 = scalar_lea.hbm %s1126_s2, 128 }
  0x30   : > { %p706_p1 = scmp.ne.s32.totalorder %s1126_s2, %s705_s7  ;;  %p712_p12 = scmp.lt.u32.totalorder %s705_s7, %s1126_s2 }
  0x32   : > { %p708_p6 = pnand %p706_p1, %p679_p9 }
  0x34   : > { %p709_p11 = pneg %p708_p6 }
  0x36   : > { %p714_p13 = pnand %p712_p12, %p709_p11 }
  0x38   : > { %717 = shalt.err (!%p714_p13)
}
  0x39   : > { %s718_s28 = scalar_lea.vmem %s945_s5, 128  ;;  %p726_p5 = scmp.lt.s32.totalorder %s945_s5, %s945_s5 }
  0x3a   : > { %p719_p3 = scmp.ne.s32.totalorder %s945_s5, %s718_s28  ;;  %p727_p10 = scmp.lt.s32.totalorder %s718_s28, %s718_s28 }
  0x3c   : > { %p721_p8 = pnand %p719_p3, %p679_p9  ;;  %p728_p2 = por %p727_p10, %p726_p5 }
  0x3e   : > { %p722_p4 = pneg %p721_p8 }
  0x40   : > { %p729_p0 = pnand %p728_p2, %p722_p4 }
  0x42   : > { %732 = shalt.err (!%p729_p0)
}
  0x43   : > { %618 = dma.hbm_to_vmem [thread:$0]  (!%p935_p7), %s1126_s2, 128, %s945_s5, [#allocation6]  }
  0x44   : > { %s568_s20 = sshll.u32 %s154_s27, 5  ;;  %s584_s22 = sshll.u32 %s833_s15, 9 }
  0x45   : > { %s999_s7 = scalar_lea.hbm %s1124_s0, %s584_s22  ;;  %s158_s29 = scalar_lea.vmem [#allocation2], %s568_s20 }
  0x46   : > { %s165_s8 = sshll.u32 %s158_s29, 4  ;;  %s1003_s9 = scalar_lea.sflag [#allocation3], %s154_s27  ;;  %s1001_s8 = int_to_ptr.vmem [resolvable:$true] %s165_s8 }
  0x47   : > { %s733_s10 = scalar_lea.hbm %s999_s7, 512  ;;  %p1141_p7 = scmp.ne.s32.totalorder %s1140_s30, 0 }
  0x48   : > { %p734_p9 = scmp.ne.s32.totalorder %s999_s7, %s733_s10  ;;  %s738_s28 = scalar_lea.hbm %s1124_s0, 1024 }
  0x49   : > { %p735_p1 = pneg %p1141_p7  ;;  %p739_p12 = scmp.lt.u32.totalorder %s999_s7, %s1124_s0 }
  0x4a   : > { %p740_p13 = scmp.lt.u32.totalorder %s738_s28, %s733_s10  ;;  %p742_p8 = scmp.lt.u32.totalorder %s733_s10, %s999_s7 }
  0x4b   : > { %p736_p6 = pnand %p735_p1, %p734_p9 }
  0x4c   : > { %p741_p3 = por %p740_p13, %p739_p12 }
  0x4d   : > { %p737_p11 = pneg %p736_p6 }
  0x4e   : > { %p743_p4 = por %p742_p8, %p741_p3 }
  0x50   : > { %p744_p5 = pnand %p743_p4, %p737_p11 }
  0x52   : > { %747 = shalt.err (!%p744_p5)
}
  0x53   : > { %s748_s27 = scalar_lea.vmem %s1001_s8, 512  ;;  %s837_s20 = smov [#allocation2]  }
  0x54   : > { %p749_p10 = scmp.ne.s32.totalorder %s1001_s8, %s748_s27  ;;  %s753_s22 = sshll.u32 %s837_s20, 4  ;;  %s754_s22 = int_to_ptr.vmem [resolvable:$false] %s753_s22 }
  0x55   : > { %s755_s4 = scalar_lea.vmem %s754_s22, 1024  ;;  %p756_p9 = scmp.lt.s32.totalorder %s1001_s8, %s754_s22 }
  0x56   : > { %p751_p2 = pnand %p749_p10, %p735_p1  ;;  %p757_p6 = scmp.lt.s32.totalorder %s755_s4, %s748_s27 }
  0x58   : > { %p752_p0 = pneg %p751_p2  ;;  %p758_p12 = por %p757_p6, %p756_p9 }
  0x5a   : > { %p759_p13 = pnand %p758_p12, %p752_p0 }
  0x5c   : > { %762 = shalt.err (!%p759_p13)
}
  0x5d   : > { %s838_s6 = smov 128   ;;  %s839_s29 = smov 8  }
  0x5e   : > { %622 = dma.hbm_to_vmem [thread:$0]  (!%p1141_p7), %s999_s7, 512, %s1001_s8, %s1003_s9, %s838_s6, %s838_s6, %s839_s29  }
  0x5f   : > { %p1142_p1 = scmp.ne.s32.totalorder %s1137_s26, 0 }
  0x60   : > { %s1034_s10 = sand.u32 (!%p1142_p1), 1, %s825_s13   ;;  %p1143_p11 = scmp.ne.s32.totalorder (!%p1142_p1), %s1134_s23, 0 }
  0x61   : > { %177 = sbr.rel (%p1142_p1) target bundleno = 857 (0x359), region = 32  ;;  %s572_s5 = sshll.u32 (!%p1142_p1), %s1034_s10, 5 }
  0x62   : > { %s180_s11 = scalar_lea.sflag (!%p1142_p1), [#allocation3], %s1034_s10  ;;  %s183_s28 = scalar_lea.vmem (!%p1142_p1), [#allocation2], %s572_s5 }
  0x68   : > { %808 = dma.done.wait (%p1143_p11), %s180_s11, 512  }
  0x69   : > { %810 = vsyncadd (%p1143_p11), %s180_s11, 4294966784  ;;  %p1144_p7 = scmp.eq.s32.totalorder %s886_s16, 0 }
  0x6b   : > { %812 = dma.done.wait (%p1144_p7), [#allocation6], 256   ;;  %p1145_p3 = pmov %p1144_p7 }
  0x6c   : > { %vm220_vm0 = vcmask 130048   ;;  %v1048_v0 = vld [vmem:[%s183_s28] sm:$0xff]  ;;  %v1050_v1 = vld [vmem:[%s183_s28 + $0x10] sm:$0xff]  ;;  %v1052_v2 = vld [vmem:[%s183_s28 + $0x8] sm:$0xff]  ;;  %v840_v9 = vmov 0.0   ;;  %vm841_vm1 = vmmov 0   ;;  %v243_v10 = vlaneseq }
  0x6d   : > { %814 = vsyncadd (%p1145_p3), [#allocation6], 4294967040  ;;  %v221_v3 = vsel %vm220_vm0, %v1048_v0, 0.0  ;;  %v227_v4 = vsel %vm220_vm0, %v1050_v1, 0.0  ;;  %v1058_v5 = vld [vmem:[%s183_s28 + $0x18] sm:$0xff]  ;;  %v224_v6 = vsel %vm220_vm0, %v1052_v2, 0.0  ;;  %590 = vmatprep.subr.mxu0 %v840_v9  ;;  %592 = vmatprep.mubr.msk.f32.mxu0 %vm841_vm1, %v840_v9 }
  0x6e   : > { %222 = vadd.xlane.f32.xlu0 %v221_v3  ;;  %228 = vadd.xlane.f32.xlu1 %v227_v4  ;;  %v230_v7 = vsel %vm220_vm0, %v1058_v5, 0.0  ;;  %v238_v8 = vld [vmem:[#allocation5] sm:$0xff]  ;;  %v244_v11 = vand.u32 127, %v243_v10  ;;  %v246_v12 = vshrl.u32 %v243_v10, 7  ;;  %vm261_vm2 = vcmask 1041409   ;;  %v341_v29 = vld [vmem:[#allocation7] sm:$0xff] }
  0x6f   : > { %591 = vmatpush3.msra.mxu0 %v238_v8  ;;  %595 = vmatprep.subr.mxu1 %v840_v9  ;;  %vm263_vm3 = vcmask 1042434   ;;  %vm265_vm4 = vcmask 1043459   ;;  %vm267_vm5 = vcmask 64512   ;;  %s213_s23 = scalar_lea.vmem [#allocation8], %s572_s5  ;;  %s585_s30 = sshll.u32 %s886_s16, 9 }
  0x70   : > { %597 = vmatprep.mubr.msk.f32.mxu1 %vm841_vm1, %v840_v9  ;;  %v247_v15 = vsub.s32 %v244_v11, %v246_v12  ;;  %596 = vmatpush3.msra.mxu1 %v341_v29  ;;  %v430_v38 = vsub.s32 1, %v246_v12  ;;  %v423_v39 = vsub.s32 0, %v246_v12  ;;  %v437_v43 = vsub.s32 2, %v246_v12  ;;  %s471_s26 = sshll.u32 %s213_s23, 4  ;;  %s1078_s9 = scalar_lea.hbm %s1127_s3, %s585_s30  ;;  %s1072_s26 = int_to_ptr.vmem [resolvable:$true] %s471_s26 }
  0x71   : > { %v444_v45 = vsub.s32 3, %v246_v12  ;;  %s458_s17 = scalar_lea.sflag [#allocation4], %s1034_s10  ;;  %s763_s19 = scalar_lea.vmem %s1072_s26, 512 }
  0x72   : > { %225 = vadd.xlane.f32.xlu0 %v224_v6  ;;  %231 = vadd.xlane.f32.xlu1 %v230_v7  ;;  %p764_p8 = scmp.ne.s32.totalorder %s1072_s26, %s763_s19  ;;  %p1146_p4 = scmp.ne.s32.totalorder %s1135_s24, 0 }
  0x73   : > { %s842_s16 = smov [#allocation8]  }
  0x74   : > { %p765_p5 = pnand %p764_p8, %p1146_p4  ;;  %s767_s27 = sshll.u32 %s842_s16, 4  ;;  %s768_s27 = int_to_ptr.vmem [resolvable:$false] %s767_s27 }
  0x75   : > { %s769_s20 = scalar_lea.vmem %s768_s27, 1024  ;;  %p770_p2 = scmp.lt.s32.totalorder %s1072_s26, %s768_s27 }
  0x76   : > { %p766_p10 = pneg %p765_p5  ;;  %p771_p0 = scmp.lt.s32.totalorder %s769_s20, %s763_s19 }
  0x78   : > { %p772_p9 = por %p771_p0, %p770_p2 }
  0x7a   : > { %p773_p6 = pnand %p772_p9, %p766_p10 }
  0xfb   : > { %v223_v13 = vpop.xlane.xlu0 %222  ;;  %v229_v14 = vpop.xlane.xlu1 %228 }
  0xfc   : > { %v234_v16 = vmul.f32 0.0625, %v223_v13  ;;  %v236_v17 = vmul.f32 0.0625, %v229_v14 }
  0xfe   : > { %v248_v22 = vrot.slane %v234_v16, %v247_v15  ;;  %v256_v25 = vrot.slane %v236_v17, %v247_v15 }
  0xff   : > { %v226_v18 = vpop.xlane.xlu0 %225  ;;  %v232_v19 = vpop.xlane.xlu1 %231 }
 0x100   : > { %v235_v20 = vmul.f32 0.0625, %v226_v18  ;;  %v237_v21 = vmul.f32 0.0625, %v232_v19 }
 0x102   : > { %v252_v23 = vrot.slane %v235_v20, %v247_v15  ;;  %v260_v24 = vrot.slane %v237_v21, %v247_v15 }
 0x104   : > { %v262_v26 = vsel %vm261_vm2, %v252_v23, %v248_v22 }
 0x105   : > { %v264_v27 = vsel %vm263_vm3, %v256_v25, %v262_v26 }
 0x106   : > { %v266_v28 = vsel %vm265_vm4, %v260_v24, %v264_v27 }
 0x107   : > { %593 = vmatmul.mubr.msk.f32.vlgmr.msra.gmra.mrb[0].mxu0 %vm267_vm5, %v266_v28 }
 0x1da   : > { %v336_v30 = vpop.f32.mrb[0].mxu0 }
 0x1db   : > { %v340_v31 = vmax.f32 %v336_v30, 0.0  ;;  %v594_v32 = vpop.f32.mrb[1].mxu0 }
 0x1dd   : > { %598 = vmatmul.mubr.msk.f32.vlgmr.msra.gmra.mrb[0].mxu1 %vm267_vm5, %v340_v31 }
 0x2b0   : > { %v411_v33 = vpop.f32.mrb[0].mxu1 }
 0x2b1   : > { %v578_v34 = vmul.f32 -1.442695, %v411_v33  ;;  %v599_v35 = vpop.f32.mrb[1].mxu1 }
 0x2b3   : > { %673 = vpow2.f32 %v578_v34 }
 0x2bd   : > { %v674_v36 = vpop.eup %673 }
 0x2be   : > { %v418_v37 = vadd.f32 1.0, %v674_v36 }
 0x2c0   : > { %675 = vrcp.f32 %v418_v37 }
 0x2ca   : > { %v676_v40 = vpop.eup %675 }
 0x2cb   : > { %v431_v41 = vrot.slane %v676_v40, %v430_v38  ;;  %v424_v42 = vrot.slane %v676_v40, %v423_v39  ;;  %v438_v44 = vrot.slane %v676_v40, %v437_v43  ;;  %v445_v46 = vrot.slane %v676_v40, %v444_v45 }
 0x2cd   : > { %433 = vbcast.lane.b32.xlu1 %v431_v41, 256  ;;  %426 = vbcast.lane.b32.xlu0 %v424_v42, 256 }
 0x2d1   : > { %440 = vbcast.lane.b32.xlu1 %v438_v44, 256 }
 0x2d5   : > { %447 = vbcast.lane.b32.xlu1 %v445_v46, 256 }
 0x33f   : > { %v434_v47 = vpop.permute.xlu1 %433  ;;  %v427_v48 = vpop.permute.xlu0 %426 }
 0x340   : > { %v450_v49 = vmul.f32 %v434_v47, %v1052_v2  ;;  %v449_v50 = vmul.f32 %v427_v48, %v1048_v0 }
 0x342   : > { %454 = vst.msk [vmem:[%s213_s23 + $0x8] sm:$0xff] %vm220_vm0, %v450_v49  ;;  %453 = vst.msk [vmem:[%s213_s23] sm:$0xff] %vm220_vm0, %v449_v50 }
 0x343   : > { %v441_v51 = vpop.permute.xlu1 %440 }
 0x344   : > { %v451_v52 = vmul.f32 %v441_v51, %v1050_v1 }
 0x346   : > { %455 = vst.msk [vmem:[%s213_s23 + $0x10] sm:$0xff] %vm220_vm0, %v451_v52 }
 0x347   : > { %v448_v53 = vpop.permute.xlu1 %447 }
 0x348   : > { %v452_v54 = vmul.f32 %v448_v53, %v1058_v5 }
 0x34a   : > { %456 = vst.msk [vmem:[%s213_s23 + $0x18] sm:$0xff] %vm220_vm0, %v452_v54 }
 0x34b   : > { %776 = shalt.err (!%p773_p6)
}
 0x34c   : > { %s777_s22 = scalar_lea.hbm %s1078_s9, 512  ;;  %s781_s29 = scalar_lea.hbm %s1127_s3, 1024 }
 0x34d   : > { %p778_p12 = scmp.ne.s32.totalorder %s1078_s9, %s777_s22  ;;  %p782_p11 = scmp.lt.u32.totalorder %s1078_s9, %s1127_s3 }
 0x34e   : > { %p783_p7 = scmp.lt.u32.totalorder %s781_s29, %s777_s22  ;;  %p785_p8 = scmp.lt.u32.totalorder %s777_s22, %s1078_s9 }
 0x34f   : > { %p779_p13 = pnand %p778_p12, %p1146_p4 }
 0x350   : > { %p784_p3 = por %p783_p7, %p782_p11 }
 0x351   : > { %p780_p1 = pneg %p779_p13 }
 0x352   : > { %p786_p5 = por %p785_p8, %p784_p3 }
 0x354   : > { %p787_p10 = pnand %p786_p5, %p780_p1 }
 0x356   : > { %790 = shalt.err (!%p787_p10)
}
 0x357   : > { %s843_s28 = smov 128   ;;  %s844_s23 = smov 8  }
 0x358   : > { %610 = dma.vmem_to_hbm [thread:$0]  (%p1146_p4), %s1072_s26, 512, %s1078_s9, %s458_s17, %s843_s28, %s843_s28, %s844_s23  }
 0x359 PF: > { %s486_s30 = sand.u32 1, %s821_s12   ;;  %p1147_p2 = scmp.ne.s32.totalorder %s1136_s25, 0 }
 0x35a   : > { %p1148_p0 = scmp.ge.s32.totalorder %s833_s15, 2  ;;  %s487_s7 = scalar_lea.sflag [#allocation4], %s486_s30 }
 0x35c   : > { %p624_p9 = pnand %p1148_p0, %p1147_p2 }
 0x35e   : > { %816 = dma.done.wait (!%p624_p9), %s487_s7, 512  }
 0x35f   : > { %818 = vsyncadd (!%p624_p9), %s487_s7, 4294966784  ;;  %p17_p6 = scmp.ge.s32.totalorder %s890_s18, 4   ;;  %s1149_s12 = smov %s825_s13 }
 0x360   : > { %s1150_s13 = smov %s829_s14  ;;  %s1151_s14 = smov %s902_s21 }
 0x361   : > { %s1152_s15 = smov %s890_s18  ;;  %19 = sbr.rel (!%p17_p6) target bundleno = 6 (0x6), region = 85 }
 0x368   :  { %492 = vsyncpa [#allocation3], 1 }
 0x369   :  { %494 = vsyncpa [#allocation3 + $0x1], 1 }
 0x36a   :  { %495 = vsyncpa [#allocation6], 1 }
 0x36b   :  { %496 = vsyncpa [#allocation4], 1 }
 0x36c   :  { %498 = vsyncpa [#allocation4 + $0x1], 1 }

</bundles_post_ra>
